<compile_context>
chip_gen: v7x
topology: tpu7x:2x2x1
jax: 0.10.0
libtpu: 0.0.40
codegen_flags: <defaults>
</compile_context>

<pallas_src>
import functools

import jax
import jax.numpy as jnp
from jax.experimental import pallas as pl
from jax.experimental.pallas import tpu as pltpu


# ---------------------------------------------------------------------------
# Fused kernel: upsample(+pad) -> concat -> [conv3x3 -> BN -> ReLU] x 2
# Internal layout: (C, H*W) with spatial flattened onto the lane axis.
# ---------------------------------------------------------------------------
def _make_up_kernel(W, S):
    """Build the fused Up kernel for static width W and flat spatial size S."""

    def shift_lanes(v, k):
        """out[..., p] = v[..., (p + k) % S] for a static shift k."""
        k = k % S
        if k == 0:
            return v
        return jnp.concatenate([v[:, k:], v[:, :k]], axis=1)

    def kernel(x1f_ref, x2f_ref, U_ref, masks_ref,
               w1_ref, s1_ref, b1_ref, w2_ref, s2_ref, b2_ref, o_ref):
        # {0,1} validity masks, shape (1, S), broadcast over channels.
        rm_top = masks_ref[0:1, :]     # 0 where row == 0     (tap dy = -1)
        rm_bot = masks_ref[1:2, :]     # 0 where row == H-1   (tap dy = +1)
        cm_left = masks_ref[2:3, :]    # 0 where col == 0     (tap dx = -1)
        cm_right = masks_ref[3:4, :]   # 0 where col == W-1   (tap dx = +1)

        def conv3x3(xin, wflat):
            # im2col in registers: tap (dy,dx) reads xin[c, p + dy*W + dx];
            # cyclic wrap / out-of-image lanes are zeroed by the masks
            # (row mask applied per dy-row is safe: wherever the dx shift
            # crosses a row boundary the col mask is zero).
            taps = []
            for dy in (-1, 0, 1):
                r = shift_lanes(xin, dy * W)
                if dy == -1:
                    r = r * rm_top
                elif dy == 1:
                    r = r * rm_bot
                for dx in (-1, 0, 1):
                    p = shift_lanes(r, dx)
                    if dx == -1:
                        p = p * cm_left
                    elif dx == 1:
                        p = p * cm_right
                    taps.append(p)
            xcol = jnp.concatenate(taps, axis=0)           # (9*Cin, S)
            return jnp.dot(wflat, xcol,                    # (Cout, 9*Cin)@(9*Cin, S)
                           preferred_element_type=jnp.float32)

        # ---- bilinear x2 upsample (align_corners) + F.pad as one matmul ----
        x1u = jnp.dot(x1f_ref[0].astype(jnp.float32), U_ref[...],
                      preferred_element_type=jnp.float32)   # (C1, S)
        # channel concat [x2, x1_upsampled] stays in registers
        xin1 = jnp.concatenate([x2f_ref[0].astype(jnp.float32), x1u], axis=0)

        # ---- conv1 -> BN -> ReLU (intermediate never leaves registers/VMEM) --
        h = conv3x3(xin1, w1_ref[...])
        h = jnp.maximum(h * s1_ref[...] + b1_ref[...], 0.0)

        # ---- conv2 -> BN -> ReLU -> lane-dense store -------------------------
        y = conv3x3(h, w2_ref[...])
        y = jnp.maximum(y * s2_ref[...] + b2_ref[...], 0.0)
        o_ref[0] = y.astype(o_ref.dtype)

    return kernel


def _upsample_pad_matrix(H1, W1, H, W, py0, px0):
    """(H1*W1, H*W) matrix folding bilinear x2 upsample (align_corners=True)
    and the subsequent F.pad:  x1u_padded_flat = x1_flat @ U.
    TODO(synk): make this separable (AH, AW) before scaling past demo sizes."""
    def interp(n_in, n_out):
        if n_in == 1:
            return jnp.ones((n_out, 1), jnp.float32)
        pos = jnp.arange(n_out, dtype=jnp.float32) * ((n_in - 1) / (n_out - 1))
        lo = jnp.floor(pos).astype(jnp.int32)
        hi = jnp.minimum(lo + 1, n_in - 1)
        frac = pos - lo.astype(jnp.float32)
        return (jax.nn.one_hot(lo, n_in, dtype=jnp.float32) * (1.0 - frac)[:, None]
                + jax.nn.one_hot(hi, n_in, dtype=jnp.float32) * frac[:, None])

    Ho, Wo = 2 * H1, 2 * W1
    AH = jnp.zeros((H, H1), jnp.float32).at[py0:py0 + Ho].set(interp(H1, Ho))
    AW = jnp.zeros((W, W1), jnp.float32).at[px0:px0 + Wo].set(interp(W1, Wo))
    # kron[(y*W+x), (h*W1+w)] = AH[y,h]*AW[x,w]
    return jnp.kron(AH, AW).T                                # (H1*W1, H*W)


def up_forward(x1_nchw, x2_nchw, params):
    """Full Up.forward.  Inputs NCHW (PyTorch convention); output NCHW."""
    N, C1, H1, W1 = x1_nchw.shape
    _, C2, H, W = x2_nchw.shape
    Ho, Wo = 2 * H1, 2 * W1
    diffY, diffX = H - Ho, W - Wo        # assumed non-negative (usual UNet case)
    S1, S = H1 * W1, H * W

    w1, w2 = params["w1"], params["w2"]              # HWIO
    Ctot, Cmid = w1.shape[2], w1.shape[3]
    Cout = w2.shape[3]
    assert Ctot == C1 + C2

    # ---- cheap shape-static prep (constant-folded under jit) ----------------
    x1f = x1_nchw.reshape(N, C1, S1)      # free reshapes of contiguous NCHW
    x2f = x2_nchw.reshape(N, C2, S)
    U = _upsample_pad_matrix(H1, W1, H, W, diffY // 2, diffX // 2)   # (S1, S)

    row = jnp.arange(S, dtype=jnp.int32) // W
    col = jnp.arange(S, dtype=jnp.int32) % W
    masks = jnp.stack([(row != 0), (row != H - 1),
                       (col != 0), (col != W - 1)]).astype(jnp.float32)  # (4,S)

    # taps flattened into the contraction dim: wflat[o, t*Cin + c] = w[kh,kw,c,o]
    w1flat = jnp.transpose(w1, (3, 0, 1, 2)).reshape(Cmid, 9 * Ctot).astype(jnp.float32)
    w2flat = jnp.transpose(w2, (3, 0, 1, 2)).reshape(Cout, 9 * Cmid).astype(jnp.float32)
    s1 = params["scale1"].reshape(Cmid, 1).astype(jnp.float32)
    b1 = params["shift1"].reshape(Cmid, 1).astype(jnp.float32)
    s2 = params["scale2"].reshape(Cout, 1).astype(jnp.float32)
    b2 = params["shift2"].reshape(Cout, 1).astype(jnp.float32)

    kernel = _make_up_kernel(W=W, S=S)

    out_flat = pl.pallas_call(
        kernel,
        out_shape=jax.ShapeDtypeStruct((N, Cout, S), x2_nchw.dtype),
        grid_spec=pltpu.PrefetchScalarGridSpec(
            num_scalar_prefetch=0,
            grid=(N,),
            in_specs=[
                pl.BlockSpec((1, C1, S1), lambda n: (n, 0, 0)),        # x1 flat
                pl.BlockSpec((1, C2, S), lambda n: (n, 0, 0)),         # x2 flat
                pl.BlockSpec((S1, S), lambda n: (0, 0)),               # U
                pl.BlockSpec((4, S), lambda n: (0, 0)),                # masks
                pl.BlockSpec((Cmid, 9 * Ctot), lambda n: (0, 0)),      # w1 flat
                pl.BlockSpec((Cmid, 1), lambda n: (0, 0)),             # scale1
                pl.BlockSpec((Cmid, 1), lambda n: (0, 0)),             # shift1
                pl.BlockSpec((Cout, 9 * Cmid), lambda n: (0, 0)),      # w2 flat
                pl.BlockSpec((Cout, 1), lambda n: (0, 0)),             # scale2
                pl.BlockSpec((Cout, 1), lambda n: (0, 0)),             # shift2
            ],
            out_specs=pl.BlockSpec((1, Cout, S), lambda n: (n, 0, 0)),
        ),
        compiler_params=pltpu.CompilerParams(
            dimension_semantics=("parallel",)),
    )(x1f, x2f, U, masks, w1flat, s1, b1, w2flat, s2, b2)

    return out_flat.reshape(N, Cout, H, W)               # already NCHW


# ---------------------------------------------------------------------------
# Pure-JAX reference (independent code path: gather upsample + HIGHEST conv)
# ---------------------------------------------------------------------------
def bilinear_upsample_x2_ac(x):
    """x: (N, H, W, C) -> (N, 2H, 2W, C), align_corners=True."""
    N, H, W, C = x.shape
    Ho, Wo = 2 * H, 2 * W
    ys = jnp.arange(Ho, dtype=jnp.float32) * ((H - 1) / (Ho - 1))
    xs = jnp.arange(Wo, dtype=jnp.float32) * ((W - 1) / (Wo - 1))
    y0 = jnp.floor(ys).astype(jnp.int32)
    x0 = jnp.floor(xs).astype(jnp.int32)
    y1 = jnp.minimum(y0 + 1, H - 1)
    x1 = jnp.minimum(x0 + 1, W - 1)
    wy = (ys - y0.astype(jnp.float32))[None, :, None, None]
    wx = (xs - x0.astype(jnp.float32))[None, None, :, None]

    def gather(yi, xi):
        return x[:, yi][:, :, xi]

    top = gather(y0, x0) * (1.0 - wx) + gather(y0, x1) * wx
    bot = gather(y1, x0) * (1.0 - wx) + gather(y1, x1) * wx
    return top * (1.0 - wy) + bot * wy


def ref_conv_bn_relu(x, w, scale, shift):
    y = jax.lax.conv_general_dilated(
        x, w, window_strides=(1, 1), padding="SAME",
        dimension_numbers=("NHWC", "HWIO", "NHWC"),
        precision=jax.lax.Precision.HIGHEST,
    )
    return jnp.maximum(y * scale[None, None, None, :] + shift[None, None, None, :], 0.0)


def ref_up_forward(x1_nchw, x2_nchw, params):
    x1 = jnp.transpose(x1_nchw, (0, 2, 3, 1))
    x2 = jnp.transpose(x2_nchw, (0, 2, 3, 1))
    x1u = bilinear_upsample_x2_ac(x1)
    diffY = x2.shape[1] - x1u.shape[1]
    diffX = x2.shape[2] - x1u.shape[2]
    x1u = jnp.pad(x1u, ((0, 0),
                        (diffY // 2, diffY - diffY // 2),
                        (diffX // 2, diffX - diffX // 2),
                        (0, 0)))
    x = jnp.concatenate([x2, x1u], axis=-1)
    h = ref_conv_bn_relu(x, params["w1"], params["scale1"], params["shift1"])
    out = ref_conv_bn_relu(h, params["w2"], params["scale2"], params["shift2"])
    return jnp.transpose(out, (0, 3, 1, 2))


# ---------------------------------------------------------------------------
# Deterministic parameter init (BN folded to scale/shift, eval-mode semantics)
# ---------------------------------------------------------------------------
def init_params(key, in_channels, out_channels):
    mid_channels = in_channels // 2
    eps = 1e-5
    ks = jax.random.split(key, 10)

    def bn_fold(kg, kb, km, kv, c):
        gamma = 1.0 + 0.1 * jax.random.normal(kg, (c,), jnp.float32)
        beta = 0.1 * jax.random.normal(kb, (c,), jnp.float32)
        mean = 0.1 * jax.random.normal(km, (c,), jnp.float32)
        var = jnp.abs(jax.random.normal(kv, (c,), jnp.float32)) + 0.5
        scale = gamma / jnp.sqrt(var + eps)
        shift = beta - mean * scale
        return scale, shift

    w1 = 0.1 * jax.random.normal(ks[0], (3, 3, in_channels, mid_channels), jnp.float32)
    w2 = 0.1 * jax.random.normal(ks[1], (3, 3, mid_channels, out_channels), jnp.float32)
    scale1, shift1 = bn_fold(ks[2], ks[3], ks[4], ks[5], mid_channels)
    scale2, shift2 = bn_fold(ks[6], ks[7], ks[8], ks[9], out_channels)
    return {"w1": w1, "scale1": scale1, "shift1": shift1,
            "w2": w2, "scale2": scale2, "shift2": shift2}


if __name__ == "__main__":
    # Up(in_channels=8, out_channels=4, bilinear=True):
    #   x1: (N, 4, 8, 8)  -> upsampled to (N, 4, 16, 16)
    #   x2: (N, 4, 16, 16); concat -> 8 channels == in_channels
    key = jax.random.PRNGKey(0)
    k_x1, k_x2, k_p = jax.random.split(key, 3)

    N, in_channels, out_channels = 2, 8, 4
    x1 = jax.random.normal(k_x1, (N, in_channels // 2, 8, 8), jnp.float32)    # NCHW
    x2 = jax.random.normal(k_x2, (N, in_channels // 2, 16, 16), jnp.float32)  # NCHW
    params = init_params(k_p, in_channels, out_channels)

    fwd = jax.jit(functools.partial(up_forward, params=params))
    out = jax.block_until_ready(fwd(x1, x2))

    ref = jax.block_until_ready(ref_up_forward(x1, x2, params))
    assert out.shape == (N, out_channels, 16, 16), out.shape
    max_err = float(jnp.max(jnp.abs(out - ref)))
    # default (non-HIGHEST) MXU precision in the kernel => loosened tolerance
    # vs. the HIGHEST-precision XLA reference.
    assert jnp.allclose(out, ref, atol=5e-2, rtol=5e-2), max_err

    print("KERNEL_OK")
</pallas_src>

<mosaic_0001>
module attributes {stable_mosaic.version = 11 : i64} {
  func.func @kernel(%arg0: i32, %arg1: memref<1x4x64xf32, #tpu.memory_space<vmem>>, %arg2: memref<1x4x256xf32, #tpu.memory_space<vmem>>, %arg3: memref<64x256xf32, #tpu.memory_space<vmem>>, %arg4: memref<4x256xf32, #tpu.memory_space<vmem>>, %arg5: memref<4x72xf32, #tpu.memory_space<vmem>>, %arg6: memref<4x1xf32, #tpu.memory_space<vmem>>, %arg7: memref<4x1xf32, #tpu.memory_space<vmem>>, %arg8: memref<4x36xf32, #tpu.memory_space<vmem>>, %arg9: memref<4x1xf32, #tpu.memory_space<vmem>>, %arg10: memref<4x1xf32, #tpu.memory_space<vmem>>, %arg11: memref<1x4x256xf32, #tpu.memory_space<vmem>>) attributes {dimension_semantics = [#tpu.dimension_semantics<parallel>], iteration_bounds = array<i64: 2>, scalar_prefetch = 0 : i64, scratch_operands = 0 : i64, tpu.core_type = #tpu.core_type<tc>, window_params = [{transform_indices = @transform_0, window_bounds = array<i64: 1, 4, 64>}, {transform_indices = @transform_1, window_bounds = array<i64: 1, 4, 256>}, {pipeline_mode = #tpu.pipeline_mode<synchronous>, transform_indices = @transform_2, window_bounds = array<i64: 64, 256>}, {pipeline_mode = #tpu.pipeline_mode<synchronous>, transform_indices = @transform_3, window_bounds = array<i64: 4, 256>}, {pipeline_mode = #tpu.pipeline_mode<synchronous>, transform_indices = @transform_4, window_bounds = array<i64: 4, 72>}, {pipeline_mode = #tpu.pipeline_mode<synchronous>, transform_indices = @transform_5, window_bounds = array<i64: 4, 1>}, {pipeline_mode = #tpu.pipeline_mode<synchronous>, transform_indices = @transform_6, window_bounds = array<i64: 4, 1>}, {pipeline_mode = #tpu.pipeline_mode<synchronous>, transform_indices = @transform_7, window_bounds = array<i64: 4, 36>}, {pipeline_mode = #tpu.pipeline_mode<synchronous>, transform_indices = @transform_8, window_bounds = array<i64: 4, 1>}, {pipeline_mode = #tpu.pipeline_mode<synchronous>, transform_indices = @transform_9, window_bounds = array<i64: 4, 1>}, {transform_indices = @transform_10, window_bounds = array<i64: 1, 4, 256>}]} {
    %c0 = arith.constant 0 : index
    %c0_0 = arith.constant 0 : index
    %0 = vector.load %arg4[%c0, %c0_0] : memref<4x256xf32, #tpu.memory_space<vmem>>, vector<1x256xf32>
    %c1 = arith.constant 1 : index
    %c0_1 = arith.constant 0 : index
    %1 = vector.load %arg4[%c1, %c0_1] : memref<4x256xf32, #tpu.memory_space<vmem>>, vector<1x256xf32>
    %c2 = arith.constant 2 : index
    %c0_2 = arith.constant 0 : index
    %2 = vector.load %arg4[%c2, %c0_2] : memref<4x256xf32, #tpu.memory_space<vmem>>, vector<1x256xf32>
    %c3 = arith.constant 3 : index
    %c0_3 = arith.constant 0 : index
    %3 = vector.load %arg4[%c3, %c0_3] : memref<4x256xf32, #tpu.memory_space<vmem>>, vector<1x256xf32>
    %c0_4 = arith.constant 0 : index
    %c0_5 = arith.constant 0 : index
    %c0_6 = arith.constant 0 : index
    %4 = vector.load %arg1[%c0_4, %c0_5, %c0_6] : memref<1x4x64xf32, #tpu.memory_space<vmem>>, vector<1x4x64xf32>
    %5 = vector.shape_cast %4 : vector<1x4x64xf32> to vector<4x64xf32>
    %c0_7 = arith.constant 0 : index
    %c0_8 = arith.constant 0 : index
    %6 = vector.load %arg3[%c0_7, %c0_8] : memref<64x256xf32, #tpu.memory_space<vmem>>, vector<64x256xf32>
    %cst = arith.constant dense<0.000000e+00> : vector<4x256xf32>
    %7 = tpu.matmul %5, %6, %cst {dimension_numbers = #tpu.dot_dimension_numbers<[1], [0], [0], [1], [0, 0, 1, 1], [], []>} : vector<4x64xf32>, vector<64x256xf32>, vector<4x256xf32> -> vector<4x256xf32>
    %c0_9 = arith.constant 0 : index
    %c0_10 = arith.constant 0 : index
    %c0_11 = arith.constant 0 : index
    %8 = vector.load %arg2[%c0_9, %c0_10, %c0_11] : memref<1x4x256xf32, #tpu.memory_space<vmem>>, vector<1x4x256xf32>
    %9 = vector.shape_cast %8 : vector<1x4x256xf32> to vector<4x256xf32>
    %10 = tpu.concatenate %9, %7 in 0 : vector<4x256xf32>, vector<4x256xf32> -> vector<8x256xf32>
    %c0_12 = arith.constant 0 : index
    %c0_13 = arith.constant 0 : index
    %11 = vector.load %arg5[%c0_12, %c0_13] : memref<4x72xf32, #tpu.memory_space<vmem>>, vector<4x72xf32>
    %12 = vector.extract_strided_slice %10 {offsets = [0, 240], sizes = [8, 16], strides = [1, 1]} : vector<8x256xf32> to vector<8x16xf32>
    %13 = vector.extract_strided_slice %10 {offsets = [0, 0], sizes = [8, 240], strides = [1, 1]} : vector<8x256xf32> to vector<8x240xf32>
    %14 = tpu.concatenate %12, %13 in 1 : vector<8x16xf32>, vector<8x240xf32> -> vector<8x256xf32>
    %15 = vector.broadcast %0 : vector<1x256xf32> to vector<8x256xf32>
    %16 = arith.mulf %14, %15 : vector<8x256xf32>
    %17 = vector.extract_strided_slice %16 {offsets = [0, 255], sizes = [8, 1], strides = [1, 1]} : vector<8x256xf32> to vector<8x1xf32>
    %18 = vector.extract_strided_slice %16 {offsets = [0, 0], sizes = [8, 255], strides = [1, 1]} : vector<8x256xf32> to vector<8x255xf32>
    %19 = tpu.concatenate %17, %18 in 1 : vector<8x1xf32>, vector<8x255xf32> -> vector<8x256xf32>
    %20 = vector.broadcast %2 : vector<1x256xf32> to vector<8x256xf32>
    %21 = arith.mulf %19, %20 : vector<8x256xf32>
    %22 = vector.extract_strided_slice %16 {offsets = [0, 1], sizes = [8, 255], strides = [1, 1]} : vector<8x256xf32> to vector<8x255xf32>
    %23 = vector.extract_strided_slice %16 {offsets = [0, 0], sizes = [8, 1], strides = [1, 1]} : vector<8x256xf32> to vector<8x1xf32>
    %24 = tpu.concatenate %22, %23 in 1 : vector<8x255xf32>, vector<8x1xf32> -> vector<8x256xf32>
    %25 = vector.broadcast %3 : vector<1x256xf32> to vector<8x256xf32>
    %26 = arith.mulf %24, %25 : vector<8x256xf32>
    %27 = vector.extract_strided_slice %10 {offsets = [0, 255], sizes = [8, 1], strides = [1, 1]} : vector<8x256xf32> to vector<8x1xf32>
    %28 = vector.extract_strided_slice %10 {offsets = [0, 0], sizes = [8, 255], strides = [1, 1]} : vector<8x256xf32> to vector<8x255xf32>
    %29 = tpu.concatenate %27, %28 in 1 : vector<8x1xf32>, vector<8x255xf32> -> vector<8x256xf32>
    %30 = vector.broadcast %2 : vector<1x256xf32> to vector<8x256xf32>
    %31 = arith.mulf %29, %30 : vector<8x256xf32>
    %32 = vector.extract_strided_slice %10 {offsets = [0, 1], sizes = [8, 255], strides = [1, 1]} : vector<8x256xf32> to vector<8x255xf32>
    %33 = vector.extract_strided_slice %10 {offsets = [0, 0], sizes = [8, 1], strides = [1, 1]} : vector<8x256xf32> to vector<8x1xf32>
    %34 = tpu.concatenate %32, %33 in 1 : vector<8x255xf32>, vector<8x1xf32> -> vector<8x256xf32>
    %35 = vector.broadcast %3 : vector<1x256xf32> to vector<8x256xf32>
    %36 = arith.mulf %34, %35 : vector<8x256xf32>
    %37 = vector.extract_strided_slice %10 {offsets = [0, 16], sizes = [8, 240], strides = [1, 1]} : vector<8x256xf32> to vector<8x240xf32>
    %38 = vector.extract_strided_slice %10 {offsets = [0, 0], sizes = [8, 16], strides = [1, 1]} : vector<8x256xf32> to vector<8x16xf32>
    %39 = tpu.concatenate %37, %38 in 1 : vector<8x240xf32>, vector<8x16xf32> -> vector<8x256xf32>
    %40 = vector.broadcast %1 : vector<1x256xf32> to vector<8x256xf32>
    %41 = arith.mulf %39, %40 : vector<8x256xf32>
    %42 = vector.extract_strided_slice %41 {offsets = [0, 255], sizes = [8, 1], strides = [1, 1]} : vector<8x256xf32> to vector<8x1xf32>
    %43 = vector.extract_strided_slice %41 {offsets = [0, 0], sizes = [8, 255], strides = [1, 1]} : vector<8x256xf32> to vector<8x255xf32>
    %44 = tpu.concatenate %42, %43 in 1 : vector<8x1xf32>, vector<8x255xf32> -> vector<8x256xf32>
    %45 = vector.broadcast %2 : vector<1x256xf32> to vector<8x256xf32>
    %46 = arith.mulf %44, %45 : vector<8x256xf32>
    %47 = vector.extract_strided_slice %41 {offsets = [0, 1], sizes = [8, 255], strides = [1, 1]} : vector<8x256xf32> to vector<8x255xf32>
    %48 = vector.extract_strided_slice %41 {offsets = [0, 0], sizes = [8, 1], strides = [1, 1]} : vector<8x256xf32> to vector<8x1xf32>
    %49 = tpu.concatenate %47, %48 in 1 : vector<8x255xf32>, vector<8x1xf32> -> vector<8x256xf32>
    %50 = vector.broadcast %3 : vector<1x256xf32> to vector<8x256xf32>
    %51 = arith.mulf %49, %50 : vector<8x256xf32>
    %52 = tpu.concatenate %21, %16, %26, %31, %10, %36, %46, %41, %51 in 0 : vector<8x256xf32>, vector<8x256xf32>, vector<8x256xf32>, vector<8x256xf32>, vector<8x256xf32>, vector<8x256xf32>, vector<8x256xf32>, vector<8x256xf32>, vector<8x256xf32> -> vector<72x256xf32>
    %cst_14 = arith.constant dense<0.000000e+00> : vector<4x256xf32>
    %53 = tpu.matmul %11, %52, %cst_14 {dimension_numbers = #tpu.dot_dimension_numbers<[1], [0], [0], [1], [0, 0, 1, 1], [], []>} : vector<4x72xf32>, vector<72x256xf32>, vector<4x256xf32> -> vector<4x256xf32>
    %c0_15 = arith.constant 0 : index
    %c0_16 = arith.constant 0 : index
    %54 = vector.load %arg6[%c0_15, %c0_16] : memref<4x1xf32, #tpu.memory_space<vmem>>, vector<4x1xf32>
    %55 = vector.broadcast %54 : vector<4x1xf32> to vector<4x256xf32>
    %56 = arith.mulf %53, %55 : vector<4x256xf32>
    %c0_17 = arith.constant 0 : index
    %c0_18 = arith.constant 0 : index
    %57 = vector.load %arg7[%c0_17, %c0_18] : memref<4x1xf32, #tpu.memory_space<vmem>>, vector<4x1xf32>
    %58 = vector.broadcast %57 : vector<4x1xf32> to vector<4x256xf32>
    %59 = arith.addf %56, %58 : vector<4x256xf32>
    %cst_19 = arith.constant 0.000000e+00 : f32
    %60 = vector.broadcast %cst_19 : f32 to vector<4x256xf32>
    %61 = arith.maximumf %59, %60 : vector<4x256xf32>
    %c0_20 = arith.constant 0 : index
    %c0_21 = arith.constant 0 : index
    %62 = vector.load %arg8[%c0_20, %c0_21] : memref<4x36xf32, #tpu.memory_space<vmem>>, vector<4x36xf32>
    %63 = vector.extract_strided_slice %61 {offsets = [0, 240], sizes = [4, 16], strides = [1, 1]} : vector<4x256xf32> to vector<4x16xf32>
    %64 = vector.extract_strided_slice %61 {offsets = [0, 0], sizes = [4, 240], strides = [1, 1]} : vector<4x256xf32> to vector<4x240xf32>
    %65 = tpu.concatenate %63, %64 in 1 : vector<4x16xf32>, vector<4x240xf32> -> vector<4x256xf32>
    %66 = vector.broadcast %0 : vector<1x256xf32> to vector<4x256xf32>
    %67 = arith.mulf %65, %66 : vector<4x256xf32>
    %68 = vector.extract_strided_slice %67 {offsets = [0, 255], sizes = [4, 1], strides = [1, 1]} : vector<4x256xf32> to vector<4x1xf32>
    %69 = vector.extract_strided_slice %67 {offsets = [0, 0], sizes = [4, 255], strides = [1, 1]} : vector<4x256xf32> to vector<4x255xf32>
    %70 = tpu.concatenate %68, %69 in 1 : vector<4x1xf32>, vector<4x255xf32> -> vector<4x256xf32>
    %71 = vector.broadcast %2 : vector<1x256xf32> to vector<4x256xf32>
    %72 = arith.mulf %70, %71 : vector<4x256xf32>
    %73 = vector.extract_strided_slice %67 {offsets = [0, 1], sizes = [4, 255], strides = [1, 1]} : vector<4x256xf32> to vector<4x255xf32>
    %74 = vector.extract_strided_slice %67 {offsets = [0, 0], sizes = [4, 1], strides = [1, 1]} : vector<4x256xf32> to vector<4x1xf32>
    %75 = tpu.concatenate %73, %74 in 1 : vector<4x255xf32>, vector<4x1xf32> -> vector<4x256xf32>
    %76 = vector.broadcast %3 : vector<1x256xf32> to vector<4x256xf32>
    %77 = arith.mulf %75, %76 : vector<4x256xf32>
    %78 = vector.extract_strided_slice %61 {offsets = [0, 255], sizes = [4, 1], strides = [1, 1]} : vector<4x256xf32> to vector<4x1xf32>
    %79 = vector.extract_strided_slice %61 {offsets = [0, 0], sizes = [4, 255], strides = [1, 1]} : vector<4x256xf32> to vector<4x255xf32>
    %80 = tpu.concatenate %78, %79 in 1 : vector<4x1xf32>, vector<4x255xf32> -> vector<4x256xf32>
    %81 = vector.broadcast %2 : vector<1x256xf32> to vector<4x256xf32>
    %82 = arith.mulf %80, %81 : vector<4x256xf32>
    %83 = vector.extract_strided_slice %61 {offsets = [0, 1], sizes = [4, 255], strides = [1, 1]} : vector<4x256xf32> to vector<4x255xf32>
    %84 = vector.extract_strided_slice %61 {offsets = [0, 0], sizes = [4, 1], strides = [1, 1]} : vector<4x256xf32> to vector<4x1xf32>
    %85 = tpu.concatenate %83, %84 in 1 : vector<4x255xf32>, vector<4x1xf32> -> vector<4x256xf32>
    %86 = vector.broadcast %3 : vector<1x256xf32> to vector<4x256xf32>
    %87 = arith.mulf %85, %86 : vector<4x256xf32>
    %88 = vector.extract_strided_slice %61 {offsets = [0, 16], sizes = [4, 240], strides = [1, 1]} : vector<4x256xf32> to vector<4x240xf32>
    %89 = vector.extract_strided_slice %61 {offsets = [0, 0], sizes = [4, 16], strides = [1, 1]} : vector<4x256xf32> to vector<4x16xf32>
    %90 = tpu.concatenate %88, %89 in 1 : vector<4x240xf32>, vector<4x16xf32> -> vector<4x256xf32>
    %91 = vector.broadcast %1 : vector<1x256xf32> to vector<4x256xf32>
    %92 = arith.mulf %90, %91 : vector<4x256xf32>
    %93 = vector.extract_strided_slice %92 {offsets = [0, 255], sizes = [4, 1], strides = [1, 1]} : vector<4x256xf32> to vector<4x1xf32>
    %94 = vector.extract_strided_slice %92 {offsets = [0, 0], sizes = [4, 255], strides = [1, 1]} : vector<4x256xf32> to vector<4x255xf32>
    %95 = tpu.concatenate %93, %94 in 1 : vector<4x1xf32>, vector<4x255xf32> -> vector<4x256xf32>
    %96 = vector.broadcast %2 : vector<1x256xf32> to vector<4x256xf32>
    %97 = arith.mulf %95, %96 : vector<4x256xf32>
    %98 = vector.extract_strided_slice %92 {offsets = [0, 1], sizes = [4, 255], strides = [1, 1]} : vector<4x256xf32> to vector<4x255xf32>
    %99 = vector.extract_strided_slice %92 {offsets = [0, 0], sizes = [4, 1], strides = [1, 1]} : vector<4x256xf32> to vector<4x1xf32>
    %100 = tpu.concatenate %98, %99 in 1 : vector<4x255xf32>, vector<4x1xf32> -> vector<4x256xf32>
    %101 = vector.broadcast %3 : vector<1x256xf32> to vector<4x256xf32>
    %102 = arith.mulf %100, %101 : vector<4x256xf32>
    %103 = tpu.concatenate %72, %67, %77, %82, %61, %87, %97, %92, %102 in 0 : vector<4x256xf32>, vector<4x256xf32>, vector<4x256xf32>, vector<4x256xf32>, vector<4x256xf32>, vector<4x256xf32>, vector<4x256xf32>, vector<4x256xf32>, vector<4x256xf32> -> vector<36x256xf32>
    %cst_22 = arith.constant dense<0.000000e+00> : vector<4x256xf32>
    %104 = tpu.matmul %62, %103, %cst_22 {dimension_numbers = #tpu.dot_dimension_numbers<[1], [0], [0], [1], [0, 0, 1, 1], [], []>} : vector<4x36xf32>, vector<36x256xf32>, vector<4x256xf32> -> vector<4x256xf32>
    %c0_23 = arith.constant 0 : index
    %c0_24 = arith.constant 0 : index
    %105 = vector.load %arg9[%c0_23, %c0_24] : memref<4x1xf32, #tpu.memory_space<vmem>>, vector<4x1xf32>
    %106 = vector.broadcast %105 : vector<4x1xf32> to vector<4x256xf32>
    %107 = arith.mulf %104, %106 : vector<4x256xf32>
    %c0_25 = arith.constant 0 : index
    %c0_26 = arith.constant 0 : index
    %108 = vector.load %arg10[%c0_25, %c0_26] : memref<4x1xf32, #tpu.memory_space<vmem>>, vector<4x1xf32>
    %109 = vector.broadcast %108 : vector<4x1xf32> to vector<4x256xf32>
    %110 = arith.addf %107, %109 : vector<4x256xf32>
    %cst_27 = arith.constant 0.000000e+00 : f32
    %111 = vector.broadcast %cst_27 : f32 to vector<4x256xf32>
    %112 = arith.maximumf %110, %111 : vector<4x256xf32>
    %c0_28 = arith.constant 0 : index
    %c0_29 = arith.constant 0 : index
    %c0_30 = arith.constant 0 : index
    %113 = vector.load %arg11[%c0_28, %c0_29, %c0_30] : memref<1x4x256xf32, #tpu.memory_space<vmem>>, vector<1x4x256xf32>
    %114 = vector.shape_cast %113 : vector<1x4x256xf32> to vector<4x256xf32>
    %115 = vector.shape_cast %112 : vector<4x256xf32> to vector<1x4x256xf32>
    tpu.vector_store %arg11[%c0_28, %c0_29, %c0_30], %115 {strides = array<i32>} : memref<1x4x256xf32, #tpu.memory_space<vmem>>, vector<1x4x256xf32>,
    return
  }
  func.func @transform_0(%arg0: i32) -> (i32, i32, i32) {
    %c0_i32 = arith.constant 0 : i32
    %c0_i32_0 = arith.constant 0 : i32
    %c0_i32_1 = arith.constant 0 : i32
    return %arg0, %c0_i32, %c0_i32_0 : i32, i32, i32
  }
  func.func @transform_1(%arg0: i32) -> (i32, i32, i32) {
    %c0_i32 = arith.constant 0 : i32
    %c0_i32_0 = arith.constant 0 : i32
    %c0_i32_1 = arith.constant 0 : i32
    return %arg0, %c0_i32, %c0_i32_0 : i32, i32, i32
  }
  func.func @transform_2(%arg0: i32) -> (i32, i32) {
    %c0_i32 = arith.constant 0 : i32
    %c0_i32_0 = arith.constant 0 : i32
    %c0_i32_1 = arith.constant 0 : i32
    return %c0_i32, %c0_i32_0 : i32, i32
  }
  func.func @transform_3(%arg0: i32) -> (i32, i32) {
    %c0_i32 = arith.constant 0 : i32
    %c0_i32_0 = arith.constant 0 : i32
    %c0_i32_1 = arith.constant 0 : i32
    return %c0_i32, %c0_i32_0 : i32, i32
  }
  func.func @transform_4(%arg0: i32) -> (i32, i32) {
    %c0_i32 = arith.constant 0 : i32
    %c0_i32_0 = arith.constant 0 : i32
    %c0_i32_1 = arith.constant 0 : i32
    return %c0_i32, %c0_i32_0 : i32, i32
  }
  func.func @transform_5(%arg0: i32) -> (i32, i32) {
    %c0_i32 = arith.constant 0 : i32
    %c0_i32_0 = arith.constant 0 : i32
    %c0_i32_1 = arith.constant 0 : i32
    return %c0_i32, %c0_i32_0 : i32, i32
  }
  func.func @transform_6(%arg0: i32) -> (i32, i32) {
    %c0_i32 = arith.constant 0 : i32
    %c0_i32_0 = arith.constant 0 : i32
    %c0_i32_1 = arith.constant 0 : i32
    return %c0_i32, %c0_i32_0 : i32, i32
  }
  func.func @transform_7(%arg0: i32) -> (i32, i32) {
    %c0_i32 = arith.constant 0 : i32
    %c0_i32_0 = arith.constant 0 : i32
    %c0_i32_1 = arith.constant 0 : i32
    return %c0_i32, %c0_i32_0 : i32, i32
  }
  func.func @transform_8(%arg0: i32) -> (i32, i32) {
    %c0_i32 = arith.constant 0 : i32
    %c0_i32_0 = arith.constant 0 : i32
    %c0_i32_1 = arith.constant 0 : i32
    return %c0_i32, %c0_i32_0 : i32, i32
  }
  func.func @transform_9(%arg0: i32) -> (i32, i32) {
    %c0_i32 = arith.constant 0 : i32
    %c0_i32_0 = arith.constant 0 : i32
    %c0_i32_1 = arith.constant 0 : i32
    return %c0_i32, %c0_i32_0 : i32, i32
  }
  func.func @transform_10(%arg0: i32) -> (i32, i32, i32) {
    %c0_i32 = arith.constant 0 : i32
    %c0_i32_0 = arith.constant 0 : i32
    %c0_i32_1 = arith.constant 0 : i32
    return %arg0, %c0_i32, %c0_i32_0 : i32, i32, i32
  }
}

</mosaic_0001>

<bundles_post_ra>
// kernel: up_forward.1
= control target key start
LH: loop header
LB: loop body
LE: loop exit
PB: predicated region body
PF: predicated region fallthrough
CT: control target
= control target key end

     0   :  { %s1167_s13 = smov 0   ;;  %s1439_s0 = inlined_call_operand.vmem [shape: f32[2,4,64], index: 0, kind: input, shape index: {}]   ;;  %s1440_s1 = inlined_call_operand.vmem [shape: f32[2,4,256], index: 1, kind: input, shape index: {}]   ;;  %s1441_s2 = inlined_call_operand.vmem [shape: f32[64,256], index: 2, kind: input, shape index: {}]   ;;  %s1442_s3 = inlined_call_operand.vmem [shape: f32[4,256], index: 3, kind: input, shape index: {}]   ;;  %s1443_s4 = inlined_call_operand.vmem [shape: f32[4,72], index: 4, kind: input, shape index: {}]   ;;  %s1444_s5 = inlined_call_operand.vmem [shape: f32[4,1], index: 5, kind: input, shape index: {}]   ;;  %s1445_s6 = inlined_call_operand.vmem [shape: f32[4,1], index: 6, kind: input, shape index: {}]   ;;  %s1446_s7 = inlined_call_operand.vmem [shape: f32[4,36], index: 7, kind: input, shape index: {}]   ;;  %s1447_s8 = inlined_call_operand.vmem [shape: f32[4,1], index: 8, kind: input, shape index: {}]   ;;  %s1448_s9 = inlined_call_operand.vmem [shape: f32[4,1], index: 9, kind: input, shape index: {}]   ;;  %s1449_s10 = inlined_call_operand.vmem [shape: f32[2,4,256], index: 10, kind: output, shape index: {}]  }
   0x1 LB: > { %s1019_s14 = sadd.s32 4294967295, %s1104_s13   ;;  %p1023_p0 = scmp.ge.s32.totalorder %s1104_s13, 1  ;;  %s1104_s13 = sphi %s1167_s13, %s20_s13  }
   0x2   : > { %p321_p1 = scmp.lt.s32.totalorder %s1104_s13, 3 }
   0x4   : > { %p322_p2 = pnand %p1023_p0, %p321_p1 }
   0x5   : > { %v386_v0 = vld [vmem:[%s1441_s2 + $0x8] sm:$0xff] (!%p322_p2)  ;;  %v388_v1 = vld [vmem:[%s1441_s2 + $0x18] sm:$0xff] (!%p322_p2)  ;;  %v385_v2 = vld [vmem:[%s1441_s2] sm:$0xff] (!%p322_p2)  ;;  %v1106_v7 = vmov (!%p322_p2), 0.0   ;;  %p363_p3 = scmp.lt.s32.totalorder (!%p322_p2), %s1019_s14, 1  ;;  %vm401_vm0 = vcmask (!%p322_p2), 523264   ;;  %v503_v34 = vlaneseq (!%p322_p2) }
   0x6   : > { %325 = sbr.rel (%p322_p2) target bundleno = 1194 (0x4aa), region = 60  ;;  %v1041_v3 = vpack.c.bf16 (!%p322_p2), %v388_v1, %v386_v0  ;;  %v387_v4 = vld [vmem:[%s1441_s2 + $0x10] sm:$0xff] (!%p322_p2)  ;;  %v390_v5 = vld [vmem:[%s1441_s2 + $0x28] sm:$0xff] (!%p322_p2)  ;;  %v392_v6 = vld [vmem:[%s1441_s2 + $0x38] sm:$0xff] (!%p322_p2)  ;;  %469 = vmatprep.mubr.f32.mxu0 (!%p322_p2), %v1106_v7  ;;  %700 = vmatprep.mubr.f32.mxu1 (!%p322_p2), %v1106_v7  ;;  %vm486_vm1 = vcmask (!%p322_p2), 1043456   ;;  %s1107_s19 = smov (!%p322_p2), 112  }
   0x7   : > { %v1043_v8 = vpack.c.bf16 (!%p322_p2), %v387_v4, %v385_v2  ;;  %v1045_v9 = vpack.c.bf16 (!%p322_p2), %v392_v6, %v390_v5  ;;  %v389_v10 = vld [vmem:[%s1441_s2 + $0x20] sm:$0xff] (!%p322_p2)  ;;  %v391_v11 = vld [vmem:[%s1441_s2 + $0x30] sm:$0xff] (!%p322_p2)  ;;  %v394_v12 = vld [vmem:[%s1441_s2 + $0x48] sm:$0xff] (!%p322_p2)  ;;  %s1108_s20 = smov (!%p322_p2), 16   ;;  %s1109_s21 = smov (!%p322_p2), 1   ;;  %v504_v35 = vshrl.u32 (!%p322_p2), %v503_v34, 7 }
   0x8   : > { %1042 = vmatprep.subr.bf16.mxu0 (!%p322_p2), %v1041_v3  ;;  %v396_v13 = vld [vmem:[%s1441_s2 + $0x58] sm:$0xff] (!%p322_p2)  ;;  %v1047_v14 = vpack.c.bf16 (!%p322_p2), %v391_v11, %v389_v10  ;;  %v393_v16 = vld [vmem:[%s1441_s2 + $0x40] sm:$0xff] (!%p322_p2)  ;;  %v395_v17 = vld [vmem:[%s1441_s2 + $0x50] sm:$0xff] (!%p322_p2)  ;;  %vm497_vm2 = vcmask (!%p322_p2), 130048   ;;  %vm589_vm3 = vcmask (!%p322_p2), 916480   ;;  %s1110_s26 = smov (!%p322_p2), 127  }
   0x9   : > { %1044 = vmatpush1.bf16.msra.mxu0 (!%p322_p2), %v1043_v8  ;;  %v1049_v15 = vpack.c.bf16 (!%p322_p2), %v396_v13, %v394_v12  ;;  %v398_v18 = vld [vmem:[%s1441_s2 + $0x68] sm:$0xff] (!%p322_p2)  ;;  %v400_v19 = vld [vmem:[%s1441_s2 + $0x78] sm:$0xff] (!%p322_p2)  ;;  %v1051_v20 = vpack.c.bf16 (!%p322_p2), %v395_v17, %v393_v16  ;;  %v397_v22 = vld [vmem:[%s1441_s2 + $0x60] sm:$0xff] (!%p322_p2)  ;;  %v505_v36 = vsub.s32 (!%p322_p2), 0, %v504_v35  ;;  %v509_v37 = vsub.s32 (!%p322_p2), 1, %v504_v35 }
   0xa   : > { %1046 = vmatprep.subr.bf16.mxu0 (!%p322_p2), %v1045_v9  ;;  %v1053_v21 = vpack.c.bf16 (!%p322_p2), %v400_v19, %v398_v18  ;;  %v399_v23 = vld [vmem:[%s1441_s2 + $0x70] sm:$0xff] (!%p322_p2)  ;;  %v377_v38 = vld [vmem:[%s1442_s3] ss:$4 sm:$0x3] (!%p322_p2)  ;;  %v1111_v56 = vmov (!%p322_p2), 0   ;;  %vm522_vm4 = vcmask (!%p322_p2), 7168  }
   0xb   : > { %v1055_v24 = vpack.c.bf16 (!%p322_p2), %v399_v23, %v397_v22  ;;  %v1260_v40 = vrot.slane (!%p322_p2), %v377_v38, %v505_v36  ;;  %v1262_v41 = vrot.slane (!%p322_p2), %v377_v38, %v509_v37  ;;  %v1029_v48 = vld [vmem:[%s1442_s3 + $0x1] ss:$4 sm:$0x3] (!%p322_p2)  ;;  %1095 = vset.pattern.permute.xlu0 (!%p322_p2), %v1111_v56  ;;  %1096 = vset.pattern.permute.xlu1 (!%p322_p2), %v1111_v56  ;;  %v1030_v61 = vld [vmem:[%s1442_s3 + $0x2] ss:$4 sm:$0x3] (!%p322_p2) }
   0xc   : > { %v1275_v50 = vrot.slane (!%p322_p2), %v1029_v48, %v505_v36  ;;  %v1277_v51 = vrot.slane (!%p322_p2), %v1029_v48, %v509_v37  ;;  %v707_v57 = vld [vmem:[%s1444_s5] sm:$0xf] (!%p322_p2)  ;;  %v1311_v63 = vrot.slane (!%p322_p2), %v1030_v61, %v505_v36  ;;  %v1313_v0 = vrot.slane (!%p322_p2), %v1030_v61, %v509_v37 }
   0xd   : > { %s1451_s14 = smov (!%p363_p3, %s1019_s14), 1  ;;  %1048 = vmatpush1.bf16.msra.mxu0 %v1047_v14  ;;  %v715_v58 = vld [vmem:[%s1445_s6] sm:$0xf]  ;;  %vm544_vm5 = vcmask 1039360   ;;  %vm632_vm6 = vcmask 588800   ;;  %vm848_vm7 = vcmask 293888  }
   0xe   : > { %1050 = vmatprep.subr.bf16.mxu0 %v1049_v15  ;;  %s1024_s29 = sshll.u32 %s1451_s14, 2  ;;  %s1039_s15 = sshll.u32 %s1451_s14, 3  ;;  %v1031_v62 = vld [vmem:[%s1442_s3 + $0x3] ss:$4 sm:$0x3] }
   0xf   : > { %s366_s12 = scalar_lea.vmem %s1439_s0, %s1024_s29  ;;  %s371_s18 = scalar_lea.vmem %s1440_s1, %s1039_s15  ;;  %v1318_v6 = vrot.slane %v1031_v62, %v505_v36 }
  0x10   : > { %v384_v25 = vld [vmem:[%s366_s12] sm:$0xf]  ;;  %s376_s28 = scalar_lea.vmem %s1449_s10, %s1039_s15 }
  0x11   : > { %1052 = vmatpush1.bf16.msra.mxu0 %v1051_v20  ;;  %v476_v26 = vld [vmem:[%s371_s18] sm:$0xff] }
  0x12   : > { %1054 = vmatprep.subr.bf16.mxu0 %v1053_v21  ;;  %v478_v28 = vcombine.high %v476_v26, %v476_v26 }
  0x15   : > { %1056 = vmatpush1.bf16.msra.mxu0 %v1055_v24 }
  0x18   : > { %1032 = vmatmul.mubr.msk.f32.vlgmr.msra.gmra.mrb[0].mxu0 %vm401_vm0, %v384_v25 }
  0x19   : > { %922 = vmatprep.mubr.f32.mxu0 %v1106_v7  ;;  %v1320_v7 = vrot.slane %v1031_v62, %v509_v37 }
  0xeb   : > { %v471_v27 = vpop.f32.mrb[0].mxu0 }
  0xec   : > { %v482_v29 = vrot.slane %v471_v27, 4  ;;  %v473_v30 = vpop.f32.mrb[1].mxu0 }
  0xed   : > { %v483_v31 = vrot.slane %v473_v30, 4 }
  0xee   : > { %v1240_v32 = vsel %vm486_vm1, %v476_v26, %v482_v29 }
  0xef   : > { %v1243_v33 = vsel %vm486_vm1, %v478_v28, %v483_v31  ;;  %585 = vrot.lane.b32.xlu1 %v1240_v32, %s1107_s19 }
  0xf0   : > { %491 = vrot.lane.b32.xlu0 %v1243_v33, %s1108_s20 }
  0xf3   : > { %587 = vrot.lane.b32.xlu1 %v1243_v33, %s1107_s19 }
  0xf4   : > { %495 = vrot.lane.b32.xlu0 %v1240_v32, %s1108_s20 }
  0xf7   : > { %566 = vrot.lane.b32.xlu1 %v1240_v32, %s1109_s21 }
  0xf8   : > { %563 = vrot.lane.b32.xlu0 %v1243_v33, %s1109_s21 }
 0x161   : > { %v586_v45 = vpop.permute.xlu1 %585 }
 0x162   : > { %v492_v39 = vpop.permute.xlu0 %491 }
 0x165   : > { %v588_v49 = vpop.permute.xlu1 %587 }
 0x166   : > { %v496_v42 = vpop.permute.xlu0 %495  ;;  %v590_v52 = vsel %vm589_vm3, %v586_v45, %v588_v49  ;;  %v594_v53 = vsel %vm589_vm3, %v588_v49, %v586_v45 }
 0x167   : > { %v498_v43 = vsel %vm497_vm2, %v496_v42, %v492_v39  ;;  %v501_v44 = vsel %vm497_vm2, %v492_v39, %v496_v42  ;;  %v1286_v54 = vmul.f32 %v1275_v50, %v590_v52  ;;  %v1289_v55 = vmul.f32 %v1277_v51, %v594_v53 }
 0x168   : > { %v513_v46 = vmul.f32 %v1260_v40, %v501_v44  ;;  %v514_v47 = vmul.f32 %v1262_v41, %v498_v43 }
 0x169   : > { %v567_v59 = vpop.permute.xlu1 %566 }
 0x16a   : > { %520 = vrot.lane.b32.xlu1 %v513_v46, %s1109_s21  ;;  %516 = vrot.lane.b32.xlu0 %v514_v47, %s1109_s21  ;;  %v564_v60 = vpop.permute.xlu0 %563 }
 0x16b   : > { %v568_v9 = vsel %vm522_vm4, %v567_v59, %v564_v60  ;;  %v571_v10 = vsel %vm522_vm4, %v564_v60, %v567_v59 }
 0x16c   : > { %v572_v17 = vmul.f32 %v571_v10, %v1311_v63  ;;  %v573_v18 = vmul.f32 %v568_v9, %v1313_v0 }
 0x16e   : > { %542 = vrot.lane.b32.xlu1 %v514_v47, %s1110_s26  ;;  %540 = vrot.lane.b32.xlu0 %v513_v46, %s1110_s26 }
 0x172   : > { %576 = vrot.lane.b32.xlu1 %v1243_v33, %s1110_s26  ;;  %574 = vrot.lane.b32.xlu0 %v1240_v32, %s1110_s26 }
 0x176   : > { %613 = vrot.lane.b32.xlu1 %v1286_v54, %s1109_s21  ;;  %609 = vrot.lane.b32.xlu0 %v1289_v55, %s1109_s21 }
 0x17a   : > { %623 = vrot.lane.b32.xlu1 %v1289_v55, %s1110_s26  ;;  %621 = vrot.lane.b32.xlu0 %v1286_v54, %s1110_s26 }
 0x17e   : > { %710 = vperm.xlu0 %1095, %v707_v57   ;;  %718 = vperm.xlu1 %1096, %v715_v58  }
 0x1dc   : > { %v521_v1 = vpop.permute.xlu1 %520  ;;  %v517_v2 = vpop.permute.xlu0 %516 }
 0x1dd   : > { %v523_v3 = vsel %vm522_vm4, %v521_v1, %v517_v2  ;;  %v526_v4 = vsel %vm522_vm4, %v517_v2, %v521_v1 }
 0x1de   : > { %v538_v5 = vmul.f32 %v1311_v63, %v526_v4  ;;  %v539_v8 = vmul.f32 %v1313_v0, %v523_v3 }
 0x1e0   : > { %v543_v11 = vpop.permute.xlu1 %542  ;;  %v541_v12 = vpop.permute.xlu0 %540  ;;  %v1057_v13 = vpack.c.bf16 %v514_v47, %v539_v8  ;;  %v1059_v14 = vpack.c.bf16 %v513_v46, %v538_v5  ;;  %v489_v47 = vld [vmem:[%s1443_s4] sm:$0xf] }
 0x1e1   : > { %v545_v15 = vsel %vm544_vm5, %v541_v12, %v543_v11  ;;  %v549_v16 = vsel %vm544_vm5, %v543_v11, %v541_v12  ;;  %v937_v11 = vld [vmem:[%s1448_s9] sm:$0xf] }
 0x1e2   : > { %v561_v19 = vmul.f32 %v1318_v6, %v545_v15  ;;  %v562_v20 = vmul.f32 %v1320_v7, %v549_v16  ;;  %1058 = vmatprep.subr.bf16.mxu1 %v1057_v13 }
 0x1e3   : > { %1060 = vmatpush1.bf16.msra.mxu1 %v1059_v14 }
 0x1e4   : > { %v577_v21 = vpop.permute.xlu1 %576  ;;  %v575_v22 = vpop.permute.xlu0 %574  ;;  %v1061_v23 = vpack.c.bf16 %v573_v18, %v562_v20  ;;  %v1063_v24 = vpack.c.bf16 %v572_v17, %v561_v19 }
 0x1e5   : > { %v578_v25 = vsel %vm544_vm5, %v575_v22, %v577_v21  ;;  %v582_v26 = vsel %vm544_vm5, %v577_v21, %v575_v22 }
 0x1e6   : > { %v583_v27 = vmul.f32 %v578_v25, %v1318_v6  ;;  %v584_v28 = vmul.f32 %v582_v26, %v1320_v7  ;;  %1062 = vmatprep.subr.bf16.mxu1 %v1061_v23 }
 0x1e7   : > { %1064 = vmatpush1.bf16.msra.mxu1 %v1063_v24 }
 0x1e8   : > { %v614_v29 = vpop.permute.xlu1 %613  ;;  %v610_v30 = vpop.permute.xlu0 %609  ;;  %v1065_v31 = vpack.c.bf16 %v584_v28, %v1243_v33  ;;  %v1067_v34 = vpack.c.bf16 %v583_v27, %v1240_v32 }
 0x1e9   : > { %v615_v35 = vsel %vm522_vm4, %v614_v29, %v610_v30  ;;  %v618_v36 = vsel %vm522_vm4, %v610_v30, %v614_v29 }
 0x1ea   : > { %v619_v37 = vmul.f32 %v618_v36, %v1311_v63  ;;  %v620_v38 = vmul.f32 %v615_v35, %v1313_v0  ;;  %1066 = vmatprep.subr.bf16.mxu1 %v1065_v31 }
 0x1eb   : > { %1068 = vmatpush1.bf16.msra.mxu1 %v1067_v34 }
 0x1ec   : > { %v624_v39 = vpop.permute.xlu1 %623  ;;  %v622_v42 = vpop.permute.xlu0 %621  ;;  %v1069_v43 = vpack.c.bf16 %v1289_v55, %v620_v38  ;;  %v1071_v44 = vpack.c.bf16 %v1286_v54, %v619_v37 }
 0x1ed   : > { %v629_v33 = vsel %vm544_vm5, %v624_v39, %v622_v42  ;;  %v625_v32 = vsel %vm544_vm5, %v622_v42, %v624_v39 }
 0x1ee   : > { %v631_v45 = vmul.f32 %v629_v33, %v1320_v7  ;;  %1070 = vmatprep.subr.bf16.mxu1 %v1069_v43  ;;  %v630_v46 = vmul.f32 %v625_v32, %v1318_v6 }
 0x1ef   : > { %1072 = vmatpush1.bf16.msra.mxu1 %v1071_v44 }
 0x1f0   : > { %652 = vmatprep.subr.mxu1 %v631_v45 }
 0x1f3   : > { %653 = vmatpush1.msra.mxu1 %v630_v46 }
 0x1f4   : > { %1033 = vmatmul.mubr.msk.f32.vlgmr.msra.gmra.mrb[0].mxu1 %vm632_vm6, %v489_v47 }
 0x1fd   : > { %v711_v48 = vpop.permute.xlu0 %710  ;;  %v719_v52 = vpop.permute.xlu1 %718 }
 0x2c7   : > { %v702_v49 = vpop.f32.mrb[0].mxu1 }
 0x2c8   : > { %v713_v53 = vmul.f32 %v711_v48, %v702_v49  ;;  %v704_v54 = vpop.f32.mrb[1].mxu1 }
 0x2c9   : > { %v714_v55 = vmul.f32 %v711_v48, %v704_v54 }
 0x2ca   : > { %v721_v56 = vadd.f32 %v719_v52, %v713_v53 }
 0x2cb   : > { %v722_v57 = vadd.f32 %v719_v52, %v714_v55 }
 0x2cc   : > { %v1350_v58 = vmax.f32 %v721_v56, 0.0 }
 0x2cd   : > { %v1352_v59 = vmax.f32 %v722_v57, 0.0 }
 0x2ce   : > { %731 = vrot.lane.b32.xlu0 %v1350_v58, %s1108_s20 }
 0x2cf   : > { %727 = vrot.lane.b32.xlu1 %v1352_v59, %s1108_s20 }
 0x2d2   : > { %787 = vrot.lane.b32.xlu0 %v1352_v59, %s1107_s19 }
 0x2d3   : > { %785 = vrot.lane.b32.xlu1 %v1350_v58, %s1107_s19 }
 0x2d6   : > { %766 = vrot.lane.b32.xlu0 %v1350_v58, %s1109_s21 }
 0x2d7   : > { %774 = vrot.lane.b32.xlu1 %v1350_v58, %s1110_s26 }
 0x2da   : > { %776 = vrot.lane.b32.xlu0 %v1352_v59, %s1110_s26 }
 0x2db   : > { %763 = vrot.lane.b32.xlu1 %v1352_v59, %s1109_s21 }
 0x340   : > { %v732_v60 = vpop.permute.xlu0 %731 }
 0x341   : > { %v728_v61 = vpop.permute.xlu1 %727 }
 0x342   : > { %v733_v62 = vsel %vm497_vm2, %v732_v60, %v728_v61  ;;  %v736_v1 = vsel %vm497_vm2, %v728_v61, %v732_v60 }
 0x343   : > { %v737_v2 = vmul.f32 %v736_v1, %v1260_v40  ;;  %v738_v3 = vmul.f32 %v733_v62, %v1262_v41  ;;  %v929_v41 = vld [vmem:[%s1447_s8] sm:$0xf] }
 0x344   : > { %v788_v4 = vpop.permute.xlu0 %787 }
 0x345   : > { %v786_v5 = vpop.permute.xlu1 %785  ;;  %744 = vrot.lane.b32.xlu0 %v737_v2, %s1109_s21  ;;  %740 = vrot.lane.b32.xlu1 %v738_v3, %s1109_s21  ;;  %v820_v30 = vrot.slane %v737_v2, 4  ;;  %v821_v31 = vrot.slane %v738_v3, 4 }
 0x346   : > { %v789_v8 = vsel %vm589_vm3, %v786_v5, %v788_v4  ;;  %v793_v9 = vsel %vm589_vm3, %v788_v4, %v786_v5 }
 0x347   : > { %v794_v10 = vmul.f32 %v789_v8, %v1275_v50  ;;  %v795_v40 = vmul.f32 %v793_v9, %v1277_v51 }
 0x348   : > { %v767_v50 = vpop.permute.xlu0 %766 }
 0x349   : > { %754 = vrot.lane.b32.xlu0 %v738_v3, %s1110_s26  ;;  %752 = vrot.lane.b32.xlu1 %v737_v2, %s1110_s26  ;;  %v775_v51 = vpop.permute.xlu1 %774  ;;  %v836_v54 = vrot.slane %v794_v10, 4  ;;  %v837_v55 = vrot.slane %v795_v40, 4 }
 0x34c   : > { %v777_v12 = vpop.permute.xlu0 %776 }
 0x34d   : > { %797 = vrot.lane.b32.xlu1 %v795_v40, %s1109_s21  ;;  %801 = vrot.lane.b32.xlu0 %v794_v10, %s1109_s21  ;;  %v764_v13 = vpop.permute.xlu1 %763  ;;  %v778_v16 = vsel %vm544_vm5, %v775_v51, %v777_v12  ;;  %v782_v17 = vsel %vm544_vm5, %v777_v12, %v775_v51 }
 0x34e   : > { %v768_v14 = vsel %vm522_vm4, %v767_v50, %v764_v13  ;;  %v771_v15 = vsel %vm522_vm4, %v764_v13, %v767_v50  ;;  %v783_v24 = vmul.f32 %v778_v16, %v1318_v6  ;;  %v784_v25 = vmul.f32 %v782_v17, %v1320_v7 }
 0x34f   : > { %v772_v22 = vmul.f32 %v771_v15, %v1311_v63  ;;  %v773_v23 = vmul.f32 %v768_v14, %v1313_v0 }
 0x350   : > { %v832_v42 = vrot.slane %v783_v24, 4  ;;  %v833_v43 = vrot.slane %v784_v25, 4 }
 0x351   : > { %809 = vrot.lane.b32.xlu1 %v794_v10, %s1110_s26  ;;  %811 = vrot.lane.b32.xlu0 %v795_v40, %s1110_s26  ;;  %v826_v36 = vrot.slane %v772_v22, 4  ;;  %v827_v37 = vrot.slane %v773_v23, 4 }
 0x352   : > { %v844_v60 = vsel %vm486_vm1, %v1350_v58, %v832_v42  ;;  %v845_v2 = vsel %vm486_vm1, %v1352_v59, %v833_v43  ;;  %v725_v59 = vld [vmem:[%s1446_s7] sm:$0xf] }
 0x355   : > { %932 = vperm.xlu1 %1096, %v929_v41   ;;  %940 = vperm.xlu0 %1095, %v937_v11  }
 0x3b7   : > { %v741_v18 = vpop.permute.xlu1 %740  ;;  %v745_v19 = vpop.permute.xlu0 %744 }
 0x3b8   : > { %v746_v20 = vsel %vm522_vm4, %v745_v19, %v741_v18  ;;  %v749_v21 = vsel %vm522_vm4, %v741_v18, %v745_v19 }
 0x3b9   : > { %v750_v26 = vmul.f32 %v749_v21, %v1311_v63  ;;  %v751_v27 = vmul.f32 %v746_v20, %v1313_v0 }
 0x3bb   : > { %v753_v28 = vpop.permute.xlu1 %752  ;;  %v755_v29 = vpop.permute.xlu0 %754  ;;  %v840_v44 = vsel %vm486_vm1, %v750_v26, %v820_v30  ;;  %v841_v46 = vsel %vm486_vm1, %v751_v27, %v821_v31 }
 0x3bc   : > { %v756_v34 = vsel %vm544_vm5, %v753_v28, %v755_v29  ;;  %v760_v35 = vsel %vm544_vm5, %v755_v29, %v753_v28 }
 0x3bd   : > { %v761_v38 = vmul.f32 %v756_v34, %v1318_v6  ;;  %v762_v39 = vmul.f32 %v760_v35, %v1320_v7 }
 0x3bf   : > { %v842_v33 = vsel %vm486_vm1, %v761_v38, %v826_v36  ;;  %v798_v32 = vpop.permute.xlu1 %797  ;;  %v802_v45 = vpop.permute.xlu0 %801  ;;  %v843_v47 = vsel %vm486_vm1, %v762_v39, %v827_v37 }
 0x3c0   : > { %v803_v48 = vsel %vm522_vm4, %v802_v45, %v798_v32  ;;  %v806_v49 = vsel %vm522_vm4, %v798_v32, %v802_v45  ;;  %v1073_v52 = vpack.c.bf16 %v843_v47, %v841_v46  ;;  %v1075_v53 = vpack.c.bf16 %v842_v33, %v840_v44 }
 0x3c1   : > { %v807_v56 = vmul.f32 %v806_v49, %v1311_v63  ;;  %v808_v57 = vmul.f32 %v803_v48, %v1313_v0 }
 0x3c2   : > { %1074 = vmatprep.subr.bf16.mxu0 %v1073_v52 }
 0x3c3   : > { %v846_v61 = vsel %vm486_vm1, %v807_v56, %v836_v54  ;;  %v810_v62 = vpop.permute.xlu1 %809  ;;  %1076 = vmatpush1.bf16.msra.mxu0 %v1075_v53  ;;  %v812_v1 = vpop.permute.xlu0 %811  ;;  %v847_v3 = vsel %vm486_vm1, %v808_v57, %v837_v55 }
 0x3c4   : > { %v817_v4 = vsel %vm544_vm5, %v812_v1, %v810_v62  ;;  %v1077_v5 = vpack.c.bf16 %v847_v3, %v845_v2  ;;  %v1079_v63 = vpack.c.bf16 %v846_v61, %v844_v60  ;;  %v813_v8 = vsel %vm544_vm5, %v810_v62, %v812_v1 }
 0x3c5   : > { %v819_v0 = vmul.f32 %v817_v4, %v1320_v7  ;;  %v818_v58 = vmul.f32 %v813_v8, %v1318_v6 }
 0x3c6   : > { %1078 = vmatprep.subr.bf16.mxu0 %v1077_v5 }
 0x3c7   : > { %1080 = vmatpush1.bf16.msra.mxu0 %v1079_v63 }
 0x3c8   : > { %1034 = vmatprep.subr.msk.mxu0 %vm486_vm1, %v819_v0 }
 0x3cb   : > { %1035 = vmatpush1.msk.msra.mxu0 %vm486_vm1, %v818_v58 }
 0x3cc   : > { %1036 = vmatmul.mubr.msk.f32.vlgmr.msra.gmra.mrb[2].mxu0 %vm848_vm7, %v725_v59 }
 0x3d4   : > { %v933_v9 = vpop.permute.xlu1 %932  ;;  %v941_v41 = vpop.permute.xlu0 %940 }
 0x49f   : > { %v924_v10 = vpop.f32.mrb[2].mxu0 }
 0x4a0   : > { %v935_v7 = vmul.f32 %v933_v9, %v924_v10  ;;  %v926_v40 = vpop.f32.mrb[3].mxu0 }
 0x4a1   : > { %v936_v11 = vmul.f32 %v933_v9, %v926_v40 }
 0x4a2   : > { %v943_v50 = vadd.f32 %v941_v41, %v935_v7 }
 0x4a3   : > { %v944_v51 = vadd.f32 %v941_v41, %v936_v11 }
 0x4a4   : > { %v945_v12 = vmax.f32 %v943_v50, 0.0 }
 0x4a5   : > { %v946_v13 = vmax.f32 %v944_v51, 0.0 }
 0x4a7   : > { %v949_v6 = vcombine.low %v945_v12, %v946_v13 }
 0x4a9   : > { %951 = vst [vmem:[%s376_s28] sm:$0xff] %v949_v6 }
 0x4aa PF: > { %s20_s13 = sadd.s32 1, %s1104_s13  }
 0x4ab   : > { %p17_p4 = scmp.ge.s32.totalorder %s20_s13, 4  }
 0x4ad   :  { %19 = sbr.rel (!%p17_p4) target bundleno = 1 (0x1), region = 96 }

</bundles_post_ra>
